<compile_context>
chip_gen: v6e
topology: v6e:2x2x1
jax: 0.10.0
libtpu: 0.0.40
codegen_flags: <defaults>
</compile_context>

<pallas_src>
import jax
import jax.numpy as jnp
from jax.experimental import pallas as pl
from jax.experimental.pallas import tpu as pltpu


def _hbm_to_hbm_copy_kernel(x_ref, o_ref, sem):
    # Single direct HBM->HBM DMA: no VMEM staging, no grid, no vld/vst work.
    copy = pltpu.make_async_copy(x_ref, o_ref, sem)
    copy.start()
    copy.wait()


def lambda_flatten(x, *, min_kernel_bytes=1 << 20):
    """Pallas equivalent of Lambda(lambda x: x.view(x.size(0), -1)).

    The flatten itself is a pure metadata reshape.  If the tensor is smaller
    than `min_kernel_bytes` we return the free reshape directly (no kernel
    launch).  Otherwise (or with min_kernel_bytes=0) a single HBM->HBM DMA
    materializes the flattened copy at HBM roofline.
    """
    n = x.shape[0]
    d = 1
    for s in x.shape[1:]:
        d *= s
    # Pure metadata view; row-major order preserved end-to-end, so the result
    # matches torch's .view on a contiguous NCHW tensor.
    x2d = x.reshape(n, d)

    total_bytes = n * d * jnp.dtype(x.dtype).itemsize
    if total_bytes < min_kernel_bytes:
        # Small-tensor bypass: launch + DMA setup exceeds the copy time by
        # orders of magnitude for small activations.
        return x2d

    return pl.pallas_call(
        _hbm_to_hbm_copy_kernel,
        out_shape=jax.ShapeDtypeStruct((n, d), x.dtype),
        in_specs=[pl.BlockSpec(memory_space=pl.ANY)],
        out_specs=pl.BlockSpec(memory_space=pl.ANY),
        scratch_shapes=[pltpu.SemaphoreType.DMA(())],
        cost_estimate=pl.CostEstimate(
            flops=0, transcendentals=0, bytes_accessed=2 * total_bytes
        ),
    )(x2d)


if __name__ == "__main__":
    key = jax.random.PRNGKey(0)
    # Small NCHW input consistent with the conv-stack usage in Meta-Learning.
    x = jax.random.normal(key, (2, 4, 16, 16), dtype=jnp.float32)

    flatten = jax.jit(lambda_flatten, static_argnames=("min_kernel_bytes",))

    # Force the Pallas HBM->HBM DMA path once so the kernel is exercised
    # (the 8 KiB demo input would otherwise take the free metadata bypass).
    out = jax.block_until_ready(flatten(x, min_kernel_bytes=0))

    # Reference: exact forward semantics of Lambda(flatten).
    ref = x.reshape(x.shape[0], -1)
    assert out.shape == (2, 4 * 16 * 16), out.shape
    assert out.dtype == x.dtype
    assert bool(jnp.array_equal(out, ref)), "mismatch vs reference flatten"

    # Default production path: small tensors bypass the kernel entirely.
    out_bypass = jax.block_until_ready(flatten(x))
    assert out_bypass.shape == ref.shape
    assert bool(jnp.array_equal(out_bypass, ref)), "bypass mismatch"

    print("KERNEL_OK")
</pallas_src>

<mosaic_0001>
module attributes {stable_mosaic.version = 11 : i64} {
  func.func @_hbm_to_hbm_copy_kernel(%arg0: memref<2x1024xf32, #tpu.memory_space<any>>, %arg1: memref<2x1024xf32, #tpu.memory_space<any>>, %arg2: memref<!tpu.dma_semaphore, #tpu.memory_space<semaphore_mem>>) attributes {dimension_semantics = [], scalar_prefetch = 0 : i64, scratch_operands = 1 : i64, tpu.core_type = #tpu.core_type<tc>} {
    tpu.enqueue_dma source(%arg0 : memref<2x1024xf32, #tpu.memory_space<any>>) target(%arg1 : memref<2x1024xf32, #tpu.memory_space<any>>) target_semaphore(%arg2 : memref<!tpu.dma_semaphore, #tpu.memory_space<semaphore_mem>>)
    tpu.wait_dma2 semaphore(%arg2 : memref<!tpu.dma_semaphore, #tpu.memory_space<semaphore_mem>>) src(%arg0 : memref<2x1024xf32, #tpu.memory_space<any>>) dst(%arg1 : memref<2x1024xf32, #tpu.memory_space<any>>)
    return
  }
}

</mosaic_0001>

<bundles_post_ra>
// kernel: lambda_flatten.1
= control target key start
LH: loop header
LB: loop body
LE: loop exit
PB: predicated region body
PF: predicated region fallthrough
CT: control target
= control target key end

     0   :  { %s66_s0 = inlined_call_operand.vmem [shape: f32[2,1024], index: 0, kind: input, shape index: {}]   ;;  %s67_s1 = inlined_call_operand.hbm [shape: f32[2,1024], index: 1, kind: output, shape index: {}]  }
   0x1   :  { %s13_s8 = sshll.u32 %s66_s0, 4  ;;  %s14_s8 = int_to_ptr.vmem [resolvable:$true] %s13_s8 }
   0x2   :  { %s28_s9 = scalar_lea.vmem %s14_s8, 256  ;;  %p33_p1 = scmp.lt.s32.totalorder %s14_s8, %s14_s8 }
   0x3   :  { %p29_p0 = scmp.ne.s32.totalorder %s14_s8, %s28_s9  ;;  %p34_p2 = scmp.lt.s32.totalorder %s28_s9, %s28_s9 }
   0x5   :  { %p35_p3 = por %p34_p2, %p33_p1 }
   0x7   :  { %p36_p4 = pnand %p35_p3, %p29_p0 }
   0x9   :  { %39 = shalt.err (!%p36_p4)  }
   0xa   :  { %16 = dma.vmem_to_hbm [thread:$0]  %s14_s8, 256, %s67_s1, [#allocation2] }
   0xb   :  { %48 = dma.done.wait [#allocation2], 256 }
   0xc   :  { %49 = vsyncadd [#allocation2], 4294967040 }
   0xd   :  { %21 = vsyncmov [#allocation2] }
  0x10   :  { %s22_s12 = vpop.sfrf %21 }
  0x11   :  { %p27_p5 = scmp.ne.s32.totalorder %s22_s12, 0 }
  0x13   :  { %26 = shalt.err (%p27_p5)  }

</bundles_post_ra>
